<compile_context>
chip_gen: v7x
topology: tpu7x:2x2x1
jax: 0.10.0
libtpu: 0.0.40
codegen_flags: <defaults>
</compile_context>

<pallas_src>
import functools

import jax
import jax.numpy as jnp
from jax.experimental import pallas as pl
from jax.experimental.pallas import tpu as pltpu


def _round_up(v, m):
    return -(-v // m) * m


# ---------------- Pallas kernel 1: tiled fused linear (conv / im2col path) ----------------
def _linear_kernel(x_ref, w_ref, b_ref, o_ref, *, relu):
    y = jnp.dot(x_ref[...], w_ref[...], preferred_element_type=jnp.float32)
    y = y + b_ref[...]
    if relu:
        y = jnp.maximum(y, 0.0)
    o_ref[...] = y.astype(o_ref.dtype)


def pallas_linear(x, w_pad, b_pad, out_cols, relu=False, block_m=512):
    """Y = act(X @ W + b).  W/b are pre-padded to (Kp, Np)/(1, Np); X is cast to bf16 and
    padded with a single jnp.pad.  M-tile is adaptive (min 8 rows, max `block_m`)."""
    M, K = x.shape
    Kp, Np = w_pad.shape
    TM = min(block_m, _round_up(M, 8))
    Mp = _round_up(M, TM)
    xp = x.astype(jnp.bfloat16)
    if Mp != M or Kp != K:
        xp = jnp.pad(xp, ((0, Mp - M), (0, Kp - K)))
    out = pl.pallas_call(
        functools.partial(_linear_kernel, relu=relu),
        out_shape=jax.ShapeDtypeStruct((Mp, Np), jnp.float32),
        grid=(Mp // TM,),
        in_specs=[
            pl.BlockSpec((TM, Kp), lambda i: (i, 0)),
            pl.BlockSpec((Kp, Np), lambda i: (0, 0)),
            pl.BlockSpec((1, Np), lambda i: (0, 0)),
        ],
        out_specs=pl.BlockSpec((TM, Np), lambda i: (i, 0)),
        compiler_params=pltpu.CompilerParams(dimension_semantics=("parallel",)),
    )(xp, w_pad, b_pad)
    return out[:M, :out_cols]


# ---------------- Pallas kernel 2: fully-fused MLP (all layers in one call) ----------------
def _fused_mlp_kernel(*refs, n_layers, skips, relu_flags):
    # refs = [x_ref, (w, b[, w_skip]) per layer ..., o_ref]; everything VMEM-resident.
    x_ref, o_ref = refs[0], refs[-1]
    xb = x_ref[...]                       # (Mp, K0p) bf16, skip input == x
    h = xb
    idx = 1
    y = None
    for li in range(n_layers):
        w = refs[idx][...]
        b = refs[idx + 1][...]
        idx += 2
        y = jnp.dot(h, w, preferred_element_type=jnp.float32)
        if li in skips:                   # cat((y, z), -1) expressed as a second matmul
            ws = refs[idx][...]
            idx += 1
            y = y + jnp.dot(xb, ws, preferred_element_type=jnp.float32)
        y = y + b
        if relu_flags[li]:
            y = jnp.maximum(y, 0.0)
        h = y.astype(jnp.bfloat16)
    o_ref[...] = y


def fused_mlp(x, prepared, out_dim, skips=(), relu_flags=None):
    """Run a whole MLP in ONE pallas_call.  `prepared` is a list of
    (w_pad bf16 (Kp,Np), b_pad f32 (1,Np), w_skip_pad-or-None) per layer."""
    M, K = x.shape
    n_layers = len(prepared)
    if relu_flags is None:
        relu_flags = (True,) * n_layers
    K0p = prepared[0][0].shape[0]
    Np_last = prepared[-1][0].shape[1]
    Mp = _round_up(M, 8)
    xp = jnp.pad(x.astype(jnp.bfloat16), ((0, Mp - M), (0, K0p - K)))
    args = [xp]
    for (w, b, ws) in prepared:
        args += [w, b]
        if ws is not None:
            args.append(ws)
    kernel = functools.partial(
        _fused_mlp_kernel, n_layers=n_layers, skips=tuple(skips),
        relu_flags=tuple(relu_flags))
    out = pl.pallas_call(
        kernel, out_shape=jax.ShapeDtypeStruct((Mp, Np_last), jnp.float32),
    )(*args)
    return out[:M, :out_dim]


# --------------------------- Backbone (simple conv FPN, NHWC) -----------------------------
def conv3x3_nhwc(x, w_pad, b_pad, cout, relu=True):
    """3x3 same-pad conv, NHWC in / NHWC out, via im2col + Pallas matmul (no transposes)."""
    # TODO(synk): at real AirMSPI resolutions the 9 taps should be built inside the kernel
    # from a halo-padded NHWC VMEM block (removes the 9x im2col HBM materialization).
    B, H, W, C = x.shape
    xp = jnp.pad(x, ((0, 0), (1, 1), (1, 1), (0, 0)))
    patches = [xp[:, dy:dy + H, dx:dx + W, :] for dy in range(3) for dx in range(3)]
    cols = jnp.concatenate(patches, axis=-1).reshape(B * H * W, 9 * C)
    y = pallas_linear(cols, w_pad, b_pad, out_cols=cout, relu=relu)
    return y.reshape(B, H, W, cout)


# --------------------------------------- sample_roi ---------------------------------------
def sample_roi(feats, uv):
    """Bilinear-sample NHWC feature maps at screen coords.
    feats: (n_cam, H, W, C); uv: (n_cam, n_q, 2) pixel coords.  Returns (n_cam, n_q, C)."""
    # TODO(synk): data-dependent gather kept in plain JAX (a Pallas version would use
    # PrefetchScalarGridSpec with the flattened indices as scalar prefetch).
    n_cam, H, W, C = feats.shape
    x = uv[..., 0]
    y = uv[..., 1]
    x0 = jnp.floor(x)
    y0 = jnp.floor(y)
    x0i = jnp.clip(x0.astype(jnp.int32), 0, W - 1)
    x1i = jnp.clip(x0i + 1, 0, W - 1)
    y0i = jnp.clip(y0.astype(jnp.int32), 0, H - 1)
    y1i = jnp.clip(y0i + 1, 0, H - 1)
    wx = jnp.clip(x - x0, 0.0, 1.0)[..., None]
    wy = jnp.clip(y - y0, 0.0, 1.0)[..., None]
    feat_flat = feats.reshape(n_cam, H * W, C)

    def gather(ix, iy):
        idx = iy * W + ix                                   # (n_cam, n_q)
        return jax.vmap(lambda f, i: f[i])(feat_flat, idx)  # (n_cam, n_q, C)

    f00 = gather(x0i, y0i)
    f01 = gather(x1i, y0i)
    f10 = gather(x0i, y1i)
    f11 = gather(x1i, y1i)
    top = f00 * (1.0 - wx) + f01 * wx
    bot = f10 * (1.0 - wx) + f11 * wx
    return top * (1.0 - wy) + bot * wy


# ---------------------------------------- forward -----------------------------------------
def ctnet_airmspi_v2_forward(pp, image, volume, query_indices, uv, cam_centers, skips):
    """Training-branch forward of CTnet (Vbatch == 1)."""
    B, n_cam, H, W = image.shape
    N = query_indices.shape[0]
    grid_sz = volume.shape[1]
    hidden = pp["hidden"]

    # image -> (B*n_cam, H, W, 1) NHWC -> backbone features (single-scale)
    img = image.reshape(B * n_cam, H, W, 1)
    w1, b1, c1 = pp["conv1"]
    w2, b2, c2 = pp["conv2"]
    f = conv3x3_nhwc(img, w1, b1, c1, relu=True)
    f = conv3x3_nhwc(f, w2, b2, c2, relu=True)
    Clat = f.shape[-1]
    feats = f.reshape(B, n_cam, H, W, Clat)

    # volume.get_query_points (synthetic): gt extinction values + normalized coords
    vol_gt = [volume[b][query_indices[:, 0], query_indices[:, 1], query_indices[:, 2]]
              for b in range(B)]
    query_points = (query_indices.astype(jnp.float32) / (grid_sz - 1)) * 2.0 - 1.0  # (N,3)

    # mlp_cam_center — one fused kernel for all layers
    cc = cam_centers.reshape(-1, 3)
    embed_cc = fused_mlp(cc, pp["cam_mlp"], out_dim=hidden, skips=skips)
    embed_cc = embed_cc.reshape(B, n_cam, N, -1)                 # (B, n_cam, N, 64)

    # mlp_xyz — one fused kernel for all layers
    qp_embed = fused_mlp(query_points, pp["xyz_mlp"], out_dim=hidden, skips=skips)  # (N,64)

    # sample_roi -> vstack -> transpose(0,1)
    latent = jnp.concatenate([sample_roi(feats[b], uv[b]) for b in range(B)], axis=0)
    latent = latent.transpose(1, 0, 2)                           # (N, B*n_cam, Clat)

    # cat xyz embedding
    qp_e = jnp.broadcast_to(qp_embed[:, None, :], (N, latent.shape[1], qp_embed.shape[-1]))
    latent = jnp.concatenate([latent, qp_e], axis=-1)

    # cat camera-center embedding (B == 1 path)
    emb = embed_cc[0].transpose(1, 0, 2)                         # (N, n_cam, 64)
    latent = jnp.concatenate([latent, emb], axis=-1)             # (N, n_cam, Clat+128)

    # decoder — all three layers (incl. final 64->1) fused into one kernel
    out = fused_mlp(latent.reshape(N, -1), pp["decoder"], out_dim=1, skips=())

    # torch.split(output, n_query) with a single batch element
    return {"output": [out], "volume": vol_gt}


# --------------------------------------- param init ---------------------------------------
def dense_params(key, fan_in, fan_out):
    k1, k2 = jax.random.split(key)
    s = float(fan_in) ** -0.5
    w = jax.random.uniform(k1, (fan_in, fan_out), jnp.float32, -s, s)
    b = jax.random.uniform(k2, (fan_out,), jnp.float32, -s, s)
    return w, b


def init_params(key, n_cam, c_lat=32, hidden=64, skips=(1,), n_layers_xyz=2):
    keys = jax.random.split(key, 12)
    params = {}
    params["conv1_w"], params["conv1_b"] = dense_params(keys[0], 9 * 1, c_lat)
    params["conv2_w"], params["conv2_b"] = dense_params(keys[1], 9 * c_lat, c_lat)

    def mlp(kbase):
        ks = jax.random.split(kbase, n_layers_xyz)
        layers = []
        for li in range(n_layers_xyz):
            din = 3 if li == 0 else (hidden + 3 if li in skips else hidden)
            layers.append(dense_params(ks[li], din, hidden))
        return layers

    params["xyz_mlp"] = mlp(keys[2])
    params["cam_mlp"] = mlp(keys[3])

    dec_in = (c_lat + 2 * hidden) * n_cam                        # decoder_input_size
    dk = jax.random.split(keys[4], 3)
    params["decoder"] = [dense_params(dk[0], dec_in, hidden),
                         dense_params(dk[1], hidden, hidden),
                         dense_params(dk[2], hidden, 1)]
    return params


# ----------------------- one-time padding / bf16 cast of all weights -----------------------
def _pad_wb(w, b):
    K, N = w.shape
    Kp, Np = _round_up(K, 128), _round_up(N, 128)
    wp = jnp.pad(w, ((0, Kp - K), (0, Np - N))).astype(jnp.bfloat16)
    bp = jnp.pad(b, (0, Np - N)).reshape(1, Np).astype(jnp.float32)
    return wp, bp


def prepare_mlp(layers, skips, in_dim, hidden):
    """Split skip-layer weights into (hidden-part, skip-part) and pad everything once."""
    prepared = []
    prev = in_dim
    for li, (w, b) in enumerate(layers):
        if li in skips:
            wm, bp = _pad_wb(w[:prev], b)          # rows acting on hidden activation
            ws, _ = _pad_wb(w[prev:], b)           # rows acting on the skip input z
            prepared.append((wm, bp, ws))
        else:
            wm, bp = _pad_wb(w, b)
            prepared.append((wm, bp, None))
        prev = hidden
    return prepared


def prepare_params(params, skips, hidden, c_lat):
    pp = {"hidden": hidden}
    w, b = _pad_wb(params["conv1_w"], params["conv1_b"])
    pp["conv1"] = (w, b, c_lat)
    w, b = _pad_wb(params["conv2_w"], params["conv2_b"])
    pp["conv2"] = (w, b, c_lat)
    pp["xyz_mlp"] = prepare_mlp(params["xyz_mlp"], skips, 3, hidden)
    pp["cam_mlp"] = prepare_mlp(params["cam_mlp"], skips, 3, hidden)
    pp["decoder"] = [(_pad_wb(w, b) + (None,)) for (w, b) in params["decoder"]]
    return pp


# ------------------------------------------ main ------------------------------------------
if __name__ == "__main__":
    key = jax.random.PRNGKey(0)
    B, n_cam, H, W = 1, 4, 16, 16
    grid_sz, N_query = 8, 8
    hidden, c_lat = 64, 32
    skips = (1,)

    k_img, k_vol, k_idx, k_par = jax.random.split(key, 4)
    params = init_params(k_par, n_cam=n_cam, c_lat=c_lat, hidden=hidden, skips=skips)
    pp = prepare_params(params, skips, hidden, c_lat)

    image = jax.random.uniform(k_img, (B, n_cam, H, W), jnp.float32)          # AirMSPI images
    volume = jax.random.uniform(k_vol, (B, grid_sz, grid_sz, grid_sz), jnp.float32)
    query_indices = jax.random.randint(k_idx, (N_query, 3), 0, grid_sz)

    # cameras.project_points (synthetic deterministic projection, screen coords)
    qp = (query_indices.astype(jnp.float32) / (grid_sz - 1)) * 2.0 - 1.0
    cam_off = jnp.linspace(-2.0, 2.0, n_cam)
    u = (qp[:, 0] * 0.5 + 0.5) * (W - 1)
    v = (qp[:, 1] * 0.5 + 0.5) * (H - 1)
    uv = jnp.stack([u[None, :] + cam_off[:, None], v[None, :] - cam_off[:, None]], -1)
    uv = jnp.clip(uv, 0.0, W - 1)[None]                                       # (B, n_cam, N, 2)
    cam_centers = jnp.broadcast_to(
        jnp.stack([cam_off, jnp.zeros(n_cam), jnp.full((n_cam,), 5.0)], -1)[None, :, None, :],
        (B, n_cam, N_query, 3),
    )

    out = ctnet_airmspi_v2_forward(pp, image, volume, query_indices, uv, cam_centers, skips)
    jax.block_until_ready(out)

    assert out["output"][0].shape == (N_query, 1)
    assert out["volume"][0].shape == (N_query,)
    print("KERNEL_OK")
</pallas_src>

<mosaic_0001>
module attributes {stable_mosaic.version = 11 : i64} {
  func.func @_linear_kernel(%arg0: i32, %arg1: memref<512x128xbf16, #tpu.memory_space<vmem>>, %arg2: memref<128x128xbf16, #tpu.memory_space<vmem>>, %arg3: memref<1x128xf32, #tpu.memory_space<vmem>>, %arg4: memref<512x128xf32, #tpu.memory_space<vmem>>) attributes {dimension_semantics = [#tpu.dimension_semantics<parallel>], iteration_bounds = array<i64: 2>, scalar_prefetch = 0 : i64, scratch_operands = 0 : i64, tpu.core_type = #tpu.core_type<tc>, window_params = [{transform_indices = @transform_0, window_bounds = array<i64: 512, 128>}, {pipeline_mode = #tpu.pipeline_mode<synchronous>, transform_indices = @transform_1, window_bounds = array<i64: 128, 128>}, {pipeline_mode = #tpu.pipeline_mode<synchronous>, transform_indices = @transform_2, window_bounds = array<i64: 1, 128>}, {transform_indices = @transform_3, window_bounds = array<i64: 512, 128>}]} {
    %c0 = arith.constant 0 : index
    %c0_0 = arith.constant 0 : index
    %0 = vector.load %arg1[%c0, %c0_0] : memref<512x128xbf16, #tpu.memory_space<vmem>>, vector<512x128xbf16>
    %c0_1 = arith.constant 0 : index
    %c0_2 = arith.constant 0 : index
    %1 = vector.load %arg2[%c0_1, %c0_2] : memref<128x128xbf16, #tpu.memory_space<vmem>>, vector<128x128xbf16>
    %cst = arith.constant dense<0.000000e+00> : vector<512x128xf32>
    %2 = tpu.matmul %0, %1, %cst {dimension_numbers = #tpu.dot_dimension_numbers<[1], [0], [0], [1], [0, 0, 1, 1], [], []>} : vector<512x128xbf16>, vector<128x128xbf16>, vector<512x128xf32> -> vector<512x128xf32>
    %c0_3 = arith.constant 0 : index
    %c0_4 = arith.constant 0 : index
    %3 = vector.load %arg3[%c0_3, %c0_4] : memref<1x128xf32, #tpu.memory_space<vmem>>, vector<1x128xf32>
    %4 = vector.broadcast %3 : vector<1x128xf32> to vector<512x128xf32>
    %5 = arith.addf %2, %4 : vector<512x128xf32>
    %cst_5 = arith.constant 0.000000e+00 : f32
    %6 = vector.broadcast %cst_5 : f32 to vector<512x128xf32>
    %7 = arith.maximumf %5, %6 : vector<512x128xf32>
    %c0_6 = arith.constant 0 : index
    %c0_7 = arith.constant 0 : index
    %8 = vector.load %arg4[%c0_6, %c0_7] : memref<512x128xf32, #tpu.memory_space<vmem>>, vector<512x128xf32>
    tpu.vector_store %arg4[%c0_6, %c0_7], %7 {strides = array<i32>} : memref<512x128xf32, #tpu.memory_space<vmem>>, vector<512x128xf32>,
    return
  }
  func.func @transform_0(%arg0: i32) -> (i32, i32) {
    %c0_i32 = arith.constant 0 : i32
    %c0_i32_0 = arith.constant 0 : i32
    return %arg0, %c0_i32 : i32, i32
  }
  func.func @transform_1(%arg0: i32) -> (i32, i32) {
    %c0_i32 = arith.constant 0 : i32
    %c0_i32_0 = arith.constant 0 : i32
    %c0_i32_1 = arith.constant 0 : i32
    return %c0_i32, %c0_i32_0 : i32, i32
  }
  func.func @transform_2(%arg0: i32) -> (i32, i32) {
    %c0_i32 = arith.constant 0 : i32
    %c0_i32_0 = arith.constant 0 : i32
    %c0_i32_1 = arith.constant 0 : i32
    return %c0_i32, %c0_i32_0 : i32, i32
  }
  func.func @transform_3(%arg0: i32) -> (i32, i32) {
    %c0_i32 = arith.constant 0 : i32
    %c0_i32_0 = arith.constant 0 : i32
    return %arg0, %c0_i32 : i32, i32
  }
}

</mosaic_0001>

<bundles_post_ra>
// kernel: tpu_custom_call.1
= control target key start
LH: loop header
LB: loop body
LE: loop exit
PB: predicated region body
PF: predicated region fallthrough
CT: control target
= control target key end

     0   :  { %8 = vsyncpa [#allocation3], 0  ;;  %s1879_s0 = inlined_call_operand.hbm [shape: bf16[1024,128], index: 0, kind: input, shape index: {}]   ;;  %s1880_s1 = inlined_call_operand.hbm [shape: bf16[128,128], index: 1, kind: input, shape index: {}]   ;;  %s1881_s2 = inlined_call_operand.vmem [shape: f32[1,128], index: 2, kind: input, shape index: {}]   ;;  %s1882_s3 = inlined_call_operand.hbm [shape: f32[1024,128], index: 3, kind: output, shape index: {}]  }
   0x1   :  { %10 = vsyncpa [#allocation3 + $0x1], 0 }
   0x2   :  { %11 = vsyncpa [#allocation6], 0 }
   0x3   :  { %12 = vsyncpa [#allocation4], 0 }
   0x4   :  { %14 = vsyncpa [#allocation4 + $0x1], 0  ;;  %s1501_s12 = smov 0   ;;  %s1503_s13 = smov 0  }
   0x5   :  { %s1505_s14 = smov 0   ;;  %s1507_s15 = smov 0  }
   0x6 LB: > { %s1522_s16 = sadd.s32 4294967295, %s1472_s15   ;;  %s1048_s17 = sadd.s32 4294967294, %s1472_s15   ;;  %s1472_s15 = sphi %s1507_s15, %s1902_s15   ;;  %s1468_s14 = sphi %s1505_s14, %s1901_s14   ;;  %s1464_s13 = sphi %s1503_s13, %s1900_s13   ;;  %s1460_s12 = sphi %s1501_s12, %s1899_s12  }
   0x7   : > { %p40_p0 = scmp.ne.s32.totalorder %s1464_s13, %s1460_s12  ;;  %p1883_p1 = scmp.eq.s32.totalorder %s1522_s16, 0 }
   0x8   : > { %p112_p3 = scmp.eq.s32.totalorder %s1048_s17, 1  ;;  %p1049_p5 = scmp.ge.s32.totalorder %s1472_s15, 1 }
   0x9   : > { %p1531_p4 = por %p1883_p1, %p40_p0  ;;  %p119_p7 = scmp.lt.s32.totalorder %s1472_s15, 3 }
   0xa   : > { %p1536_p6 = por %p112_p3, %p40_p0  ;;  %s1474_s21 = smov [#allocation5]  }
   0xb   : > { %s1886_s18 = scalar_select %p1531_p4, 1, 0 }
   0xc   : > { %s1887_s19 = scalar_select %p1536_p6, 1, 0 }
   0xd   : > { %p1541_p8 = pnand %p1049_p5, %p119_p7  ;;  %s131_s22 = sshll.u32 %s1474_s21, 4  ;;  %s1545_s22 = int_to_ptr.vmem [resolvable:$true] %s131_s22 }
   0xe   : > { %s1557_s24 = sadd.s32 1, %s1472_s15   ;;  %s27_s25 = sadd.s32 1, %s1468_s14 }
   0xf   : > { %s1888_s20 = scalar_select %p1541_p8, 1, 0 }
  0x10   : > { %p1251_p9 = pneg %p1541_p8  ;;  %s24_s26 = ssub.s32 %s1472_s15, %s1557_s24 }
  0x11   : > { %s1344_s29 = scalar_lea.hbm %s1880_s1, 1024 }
  0x12   : > { %p1552_p11 = pnand %p1251_p9, %p1883_p1  ;;  %p1345_p12 = scmp.ne.s32.totalorder %s1880_s1, %s1344_s29 }
  0x13   : > { %p1351_p5 = scmp.lt.u32.totalorder %s1344_s29, %s1880_s1 }
  0x14   : > { %p1346_p13 = pneg %p1552_p11 }
  0x16   : > { %p1347_p0 = pnand %p1346_p13, %p1345_p12 }
  0x18   : > { %p1348_p3 = pneg %p1347_p0 }
  0x1a   : > { %p1353_p7 = pnand %p1351_p5, %p1348_p3 }
  0x1c   : > { %1356 = shalt.err (!%p1353_p7)
}
  0x1d   : > { %s1357_s7 = scalar_lea.vmem %s1545_s22, 1024  ;;  %p1365_p2 = scmp.lt.s32.totalorder %s1545_s22, %s1545_s22 }
  0x1e   : > { %p1358_p9 = scmp.ne.s32.totalorder %s1545_s22, %s1357_s7  ;;  %p1366_p6 = scmp.lt.s32.totalorder %s1357_s7, %s1357_s7 }
  0x20   : > { %p1360_p10 = pnand %p1358_p9, %p1346_p13  ;;  %p1367_p4 = por %p1366_p6, %p1365_p2 }
  0x22   : > { %p1361_p1 = pneg %p1360_p10 }
  0x24   : > { %p1368_p8 = pnand %p1367_p4, %p1361_p1 }
  0x26   : > { %1371 = shalt.err (!%p1368_p8)
}
  0x27   : > { %s1475_s8 = smov 64   ;;  %s1476_s9 = smov 4  }
  0x28   : > { %1254 = dma.hbm_to_vmem [thread:$0]  (!%p1552_p11), %s1880_s1, 1024, %s1545_s22, [#allocation6], %s1475_s8, %s1475_s8, %s1476_s9  }
  0x29   : > { %p25_p1 = scmp.eq.s32.totalorder %s24_s26, 0  ;;  %p34_p2 = scmp.ne.s32.totalorder %s1468_s14, %s1464_s13 }
  0x2a   : > { %p35_p4 = scmp.eq.s32.totalorder %s1472_s15, 0  ;;  %p1264_p6 = scmp.lt.s32.totalorder %s1472_s15, 2 }
  0x2b   : > { %s1591_s17 = scalar_select %p25_p1, %s1468_s14, %s27_s25  }
  0x2c   : > { %p36_p8 = por %p35_p4, %p34_p2  ;;  %p1890_p10 = scmp.eq.s32.totalorder %s1522_s16, 1 }
  0x2d   : > { %s148_s23 = sand.u32 1, %s1468_s14   ;;  %s1105_s27 = sshll.u32 %s1472_s15, 12 }
  0x2e   : > { %p1595_p12 = por %p1890_p10, %p34_p2  ;;  %s1052_s28 = sshll.u32 %s148_s23, 8 }
  0x2f   : > { %s1604_s4 = scalar_lea.hbm %s1879_s0, %s1105_s27  ;;  %s152_s22 = scalar_lea.vmem [#allocation2], %s1052_s28 }
  0x30   : > { %s159_s25 = sshll.u32 %s152_s22, 4  ;;  %p1606_p11 = pnand %p1264_p6, %p36_p8  ;;  %s1610_s25 = int_to_ptr.vmem [resolvable:$true] %s159_s25 }
  0x31   : > { %s1612_s5 = scalar_lea.sflag [#allocation3], %s148_s23  ;;  %s1372_s6 = scalar_lea.hbm %s1604_s4, 4096 }
  0x32   : > { %p1373_p13 = scmp.ne.s32.totalorder %s1604_s4, %s1372_s6  ;;  %p1374_p0 = pneg %p1606_p11 }
  0x33   : > { %s1377_s11 = scalar_lea.hbm %s1879_s0, 8192  ;;  %p1378_p7 = scmp.lt.u32.totalorder %s1604_s4, %s1879_s0 }
  0x34   : > { %p1375_p3 = pnand %p1374_p0, %p1373_p13  ;;  %p1379_p9 = scmp.lt.u32.totalorder %s1377_s11, %s1372_s6 }
  0x35   : > { %p1381_p2 = scmp.lt.u32.totalorder %s1372_s6, %s1604_s4 }
  0x36   : > { %p1376_p5 = pneg %p1375_p3  ;;  %p1380_p1 = por %p1379_p9, %p1378_p7 }
  0x38   : > { %p1382_p4 = por %p1381_p2, %p1380_p1 }
  0x3a   : > { %p1383_p6 = pnand %p1382_p4, %p1376_p5 }
  0x3c   : > { %1386 = shalt.err (!%p1383_p6)
}
  0x3d   : > { %s1387_s23 = scalar_lea.vmem %s1610_s25, 4096  ;;  %s1477_s29 = smov [#allocation2]  }
  0x3e   : > { %p1388_p8 = scmp.ne.s32.totalorder %s1610_s25, %s1387_s23  ;;  %s1392_s30 = sshll.u32 %s1477_s29, 4  ;;  %s1393_s30 = int_to_ptr.vmem [resolvable:$false] %s1392_s30 }
  0x3f   : > { %s1394_s22 = scalar_lea.vmem %s1393_s30, 8192  ;;  %p1395_p3 = scmp.lt.s32.totalorder %s1610_s25, %s1393_s30 }
  0x40   : > { %p1390_p10 = pnand %p1388_p8, %p1374_p0  ;;  %p1396_p7 = scmp.lt.s32.totalorder %s1394_s22, %s1387_s23 }
  0x42   : > { %p1391_p13 = pneg %p1390_p10  ;;  %p1397_p9 = por %p1396_p7, %p1395_p3 }
  0x44   : > { %p1398_p1 = pnand %p1397_p9, %p1391_p13 }
  0x46   : > { %1401 = shalt.err (!%p1398_p1)
}
  0x47   : > { %1258 = dma.hbm_to_vmem [thread:$0]  (!%p1606_p11), %s1604_s4, 4096, %s1610_s25, %s1612_s5, %s1475_s8, %s1475_s8, %s1476_s9  }
  0x48   : > { %p1893_p0 = scmp.ne.s32.totalorder %s1888_s20, 0 }
  0x49   : > { %s1646_s6 = sand.u32 (!%p1893_p0), 1, %s1464_s13   ;;  %p1894_p5 = scmp.ne.s32.totalorder (!%p1893_p0), %s1886_s18, 0 }
  0x4a   : > { %171 = sbr.rel (%p1893_p0) target bundleno = 408 (0x198), region = 32  ;;  %s1056_s7 = sshll.u32 (!%p1893_p0), %s1646_s6, 8 }
  0x4b   : > { %s174_s10 = scalar_lea.sflag (!%p1893_p0), [#allocation3], %s1646_s6  ;;  %s1650_s11 = scalar_lea.vmem (!%p1893_p0), [#allocation2], %s1056_s7 }
  0x51   : > { %1447 = dma.done.wait (%p1894_p5), %s174_s10, 4096  }
  0x52   : > { %1449 = vsyncadd (%p1894_p5), %s174_s10, 4294963200  ;;  %p1895_p11 = scmp.eq.s32.totalorder %s1522_s16, 0 }
  0x54   : > { %1451 = dma.done.wait (%p1895_p11), [#allocation6], 1024   ;;  %p1896_p2 = pmov %p1895_p11 }
  0x55   : > { %v1304_v0 = vld [vmem:[#allocation5] sm:$0xff]   ;;  %v1305_v1 = vld [vmem:[#allocation5 + $0x8] sm:$0xff]   ;;  %v1306_v2 = vld [vmem:[#allocation5 + $0x10] sm:$0xff]   ;;  %s1058_s8 = sshll.u32 %s1646_s6, 9  ;;  %s1106_s4 = sshll.u32 %s1522_s16, 13 }
  0x56   : > { %1453 = vsyncadd (%p1896_p2), [#allocation6], 4294966272  ;;  %1147 = vmatprep.subr.bf16.mxu0 %v1304_v0  ;;  %1227 = vmatprep.subr.bf16.mxu1 %v1304_v0  ;;  %v1307_v3 = vld [vmem:[#allocation5 + $0x18] sm:$0xff]   ;;  %v1312_v4 = vld [vmem:[%s1650_s11] sm:$0xff]   ;;  %s1706_s9 = scalar_lea.vmem [#allocation7], %s1058_s8  ;;  %s1827_s5 = scalar_lea.hbm %s1882_s3, %s1106_s4 }
  0x57   : > { %1148 = vmatpush3.bf16.msra.mxu0 %v1304_v0  ;;  %1235 = vmatpush3.bf16.msra.mxu1 %v1304_v0  ;;  %v1313_v5 = vld [vmem:[%s1650_s11 + $0x80] sm:$0xff]   ;;  %v1309_v7 = vld [vmem:[#allocation5 + $0x28] sm:$0xff]   ;;  %v1310_v8 = vld [vmem:[#allocation5 + $0x30] sm:$0xff]   ;;  %s965_s25 = sshll.u32 %s1706_s9, 4  ;;  %s952_s27 = scalar_lea.sflag [#allocation4], %s1646_s6  ;;  %s1829_s25 = int_to_ptr.vmem [resolvable:$true] %s965_s25 }
  0x58   : > { %1149 = vmatprep.subr.bf16.mxu0 %v1305_v1  ;;  %1228 = vmatprep.subr.bf16.mxu1 %v1305_v1  ;;  %v1308_v6 = vld [vmem:[#allocation5 + $0x20] sm:$0xff]   ;;  %v1311_v9 = vld [vmem:[#allocation5 + $0x38] sm:$0xff]   ;;  %v1314_v10 = vld [vmem:[%s1650_s11 + $0x8] sm:$0xff]   ;;  %s1402_s28 = scalar_lea.vmem %s1829_s25, 8192  ;;  %s1478_s23 = smov [#allocation7]  }
  0x59   : > { %1163 = vmatprep.mubr.bf16.mxu0 %v1312_v4  ;;  %1195 = vmatprep.mubr.bf16.mxu1 %v1313_v5  ;;  %v1315_v11 = vld [vmem:[%s1650_s11 + $0x88] sm:$0xff]   ;;  %v1316_v12 = vld [vmem:[%s1650_s11 + $0x10] sm:$0xff]   ;;  %v1318_v14 = vld [vmem:[%s1650_s11 + $0x18] sm:$0xff]   ;;  %p1403_p4 = scmp.ne.s32.totalorder %s1829_s25, %s1402_s28  ;;  %s1406_s29 = sshll.u32 %s1478_s23, 4  ;;  %s1407_s29 = int_to_ptr.vmem [resolvable:$false] %s1406_s29 }
  0x5a   : > { %v1317_v13 = vld [vmem:[%s1650_s11 + $0x90] sm:$0xff]   ;;  %v1319_v15 = vld [vmem:[%s1650_s11 + $0x98] sm:$0xff]   ;;  %v1320_v16 = vld [vmem:[%s1650_s11 + $0x20] sm:$0xff]   ;;  %s1408_s30 = scalar_lea.vmem %s1407_s29, 16384  ;;  %p1409_p10 = scmp.lt.s32.totalorder %s1829_s25, %s1407_s29 }
  0x5b   : > { %1150 = vmatpush3.bf16.msra.mxu0 %v1305_v1  ;;  %1236 = vmatpush3.bf16.msra.mxu1 %v1305_v1  ;;  %v1321_v17 = vld [vmem:[%s1650_s11 + $0xa0] sm:$0xff]   ;;  %v1322_v18 = vld [vmem:[%s1650_s11 + $0x28] sm:$0xff]   ;;  %v1324_v20 = vld [vmem:[%s1650_s11 + $0x30] sm:$0xff]   ;;  %p1404_p6 = pnand %p1403_p4, %p1595_p12  ;;  %p1410_p13 = scmp.lt.s32.totalorder %s1408_s30, %s1402_s28 }
  0x5c   : > { %1151 = vmatprep.subr.bf16.mxu0 %v1306_v2  ;;  %1229 = vmatprep.subr.bf16.mxu1 %v1306_v2  ;;  %v1323_v19 = vld [vmem:[%s1650_s11 + $0xa8] sm:$0xff]   ;;  %v1325_v21 = vld [vmem:[%s1650_s11 + $0xb0] sm:$0xff]   ;;  %v1326_v22 = vld [vmem:[%s1650_s11 + $0x38] sm:$0xff]  }
  0x5d   : > { %v1327_v23 = vld [vmem:[%s1650_s11 + $0xb8] sm:$0xff]   ;;  %v1328_v24 = vld [vmem:[%s1650_s11 + $0x40] sm:$0xff]   ;;  %v1330_v26 = vld [vmem:[%s1650_s11 + $0x48] sm:$0xff]   ;;  %p1405_p8 = pneg %p1404_p6  ;;  %p1411_p3 = por %p1410_p13, %p1409_p10 }
  0x5e   : > { %v1329_v25 = vld [vmem:[%s1650_s11 + $0xc0] sm:$0xff]   ;;  %v1331_v27 = vld [vmem:[%s1650_s11 + $0xc8] sm:$0xff]   ;;  %v1332_v28 = vld [vmem:[%s1650_s11 + $0x50] sm:$0xff]  }
  0x5f   : > { %1152 = vmatpush3.bf16.msra.mxu0 %v1306_v2  ;;  %1237 = vmatpush3.bf16.msra.mxu1 %v1306_v2  ;;  %v1333_v29 = vld [vmem:[%s1650_s11 + $0xd0] sm:$0xff]   ;;  %v1334_v30 = vld [vmem:[%s1650_s11 + $0x58] sm:$0xff]   ;;  %v1336_v32 = vld [vmem:[%s1650_s11 + $0x60] sm:$0xff]   ;;  %p1412_p7 = pnand %p1411_p3, %p1405_p8 }
  0x60   : > { %1153 = vmatprep.subr.bf16.mxu0 %v1307_v3  ;;  %1230 = vmatprep.subr.bf16.mxu1 %v1307_v3  ;;  %v1335_v31 = vld [vmem:[%s1650_s11 + $0xd8] sm:$0xff]   ;;  %v1337_v33 = vld [vmem:[%s1650_s11 + $0xe0] sm:$0xff]   ;;  %v1338_v34 = vld [vmem:[%s1650_s11 + $0x68] sm:$0xff]  }
  0x61   : > { %v1339_v35 = vld [vmem:[%s1650_s11 + $0xe8] sm:$0xff]   ;;  %v1340_v36 = vld [vmem:[%s1650_s11 + $0x70] sm:$0xff]   ;;  %v1342_v38 = vld [vmem:[%s1650_s11 + $0x78] sm:$0xff]  }
  0x62   : > { %v1341_v37 = vld [vmem:[%s1650_s11 + $0xf0] sm:$0xff]   ;;  %v1343_v39 = vld [vmem:[%s1650_s11 + $0xf8] sm:$0xff]   ;;  %v1695_v40 = vld [vmem:[%s1881_s2] ss:$0 sm:$0xff] }
  0x63   : > { %1154 = vmatpush3.bf16.msra.mxu0 %v1307_v3  ;;  %1238 = vmatpush3.bf16.msra.mxu1 %v1307_v3 }
  0x64   : > { %1155 = vmatprep.subr.bf16.mxu0 %v1308_v6  ;;  %1231 = vmatprep.subr.bf16.mxu1 %v1308_v6 }
  0x67   : > { %1156 = vmatpush3.bf16.msra.mxu0 %v1308_v6  ;;  %1239 = vmatpush3.bf16.msra.mxu1 %v1308_v6 }
  0x68   : > { %1157 = vmatprep.subr.bf16.mxu0 %v1309_v7  ;;  %1232 = vmatprep.subr.bf16.mxu1 %v1309_v7 }
  0x6b   : > { %1158 = vmatpush3.bf16.msra.mxu0 %v1309_v7  ;;  %1240 = vmatpush3.bf16.msra.mxu1 %v1309_v7 }
  0x6c   : > { %1159 = vmatprep.subr.bf16.mxu0 %v1310_v8  ;;  %1233 = vmatprep.subr.bf16.mxu1 %v1310_v8 }
  0x6f   : > { %1160 = vmatpush3.bf16.msra.mxu0 %v1310_v8  ;;  %1241 = vmatpush3.bf16.msra.mxu1 %v1310_v8 }
  0x70   : > { %1161 = vmatprep.subr.bf16.mxu0 %v1311_v9  ;;  %1234 = vmatprep.subr.bf16.mxu1 %v1311_v9 }
  0x73   : > { %1162 = vmatpush3.bf16.msra.mxu0 %v1311_v9  ;;  %1242 = vmatpush3.bf16.msra.mxu1 %v1311_v9 }
  0x76   : > { %1164 = vmatmul.mubr.bf16.vlgmr.msra.gmra.mrb[0].mxu0 %v1314_v10  ;;  %1196 = vmatmul.mubr.bf16.vlgmr.msra.gmra.mrb[0].mxu1 %v1315_v11 }
  0x77   : > { %1167 = vmatprep.mubr.bf16.mxu0 %v1316_v12  ;;  %1199 = vmatprep.mubr.bf16.mxu1 %v1317_v13 }
  0x7e   : > { %1168 = vmatmul.mubr.bf16.gmra.mrb[4].mxu0 %v1318_v14  ;;  %1200 = vmatmul.mubr.bf16.gmra.mrb[4].mxu1 %v1319_v15 }
  0x7f   : > { %1171 = vmatprep.mubr.bf16.mxu0 %v1320_v16  ;;  %1203 = vmatprep.mubr.bf16.mxu1 %v1321_v17 }
  0x86   : > { %1172 = vmatmul.mubr.bf16.gmra.mrb[8].mxu0 %v1322_v18  ;;  %1204 = vmatmul.mubr.bf16.gmra.mrb[8].mxu1 %v1323_v19 }
  0x87   : > { %1175 = vmatprep.mubr.bf16.mxu0 %v1324_v20  ;;  %1207 = vmatprep.mubr.bf16.mxu1 %v1325_v21 }
  0x8e   : > { %1176 = vmatmul.mubr.bf16.gmra.mrb[12].mxu0 %v1326_v22  ;;  %1208 = vmatmul.mubr.bf16.gmra.mrb[12].mxu1 %v1327_v23 }
  0x8f   : > { %1179 = vmatprep.mubr.bf16.mxu0 %v1328_v24  ;;  %1211 = vmatprep.mubr.bf16.mxu1 %v1329_v25 }
  0x96   : > { %1180 = vmatmul.mubr.bf16.gmra.mrb[16].mxu0 %v1330_v26  ;;  %1212 = vmatmul.mubr.bf16.gmra.mrb[16].mxu1 %v1331_v27 }
  0x97   : > { %1183 = vmatprep.mubr.bf16.mxu0 %v1332_v28  ;;  %1215 = vmatprep.mubr.bf16.mxu1 %v1333_v29 }
  0x9e   : > { %1184 = vmatmul.mubr.bf16.gmra.mrb[20].mxu0 %v1334_v30  ;;  %1216 = vmatmul.mubr.bf16.gmra.mrb[20].mxu1 %v1335_v31 }
  0x9f   : > { %1187 = vmatprep.mubr.bf16.mxu0 %v1336_v32  ;;  %1219 = vmatprep.mubr.bf16.mxu1 %v1337_v33 }
  0xa6   : > { %1188 = vmatmul.mubr.bf16.gmra.mrb[24].mxu0 %v1338_v34  ;;  %1220 = vmatmul.mubr.bf16.gmra.mrb[24].mxu1 %v1339_v35 }
  0xa7   : > { %1191 = vmatprep.mubr.bf16.mxu0 %v1340_v36  ;;  %1223 = vmatprep.mubr.bf16.mxu1 %v1341_v37 }
  0xae   : > { %1192 = vmatmul.mubr.bf16.gmra.mrb[28].mxu0 %v1342_v38  ;;  %1224 = vmatmul.mubr.bf16.gmra.mrb[28].mxu1 %v1343_v39 }
 0x149   : > { %v1165_v41 = vpop.f32.mrb[0].mxu0  ;;  %v1197_v42 = vpop.f32.mrb[0].mxu1 }
 0x14a   : > { %v577_v43 = vadd.f32 %v1165_v41, %v1695_v40  ;;  %v705_v44 = vadd.f32 %v1197_v42, %v1695_v40  ;;  %v568_v45 = vpop.f32.mrb[1].mxu0  ;;  %v696_v46 = vpop.f32.mrb[1].mxu1 }
 0x14b   : > { %v569_v47 = vadd.f32 %v1695_v40, %v568_v45  ;;  %v697_v48 = vadd.f32 %v1695_v40, %v696_v46  ;;  %v1166_v49 = vpop.f32.mrb[2].mxu0  ;;  %v1198_v50 = vpop.f32.mrb[2].mxu1 }
 0x14c   : > { %v825_v51 = vmax.f32 %v577_v43, 0.0  ;;  %v857_v52 = vmax.f32 %v705_v44, 0.0  ;;  %v580_v53 = vadd.f32 %v1166_v49, %v1695_v40  ;;  %v708_v54 = vadd.f32 %v1198_v50, %v1695_v40  ;;  %v571_v55 = vpop.f32.mrb[3].mxu0  ;;  %v699_v56 = vpop.f32.mrb[3].mxu1 }
 0x14d   : > { %v823_v57 = vmax.f32 %v569_v47, 0.0  ;;  %v855_v58 = vmax.f32 %v697_v48, 0.0  ;;  %v572_v59 = vadd.f32 %v1695_v40, %v571_v55  ;;  %v700_v60 = vadd.f32 %v1695_v40, %v699_v56 }
 0x14e   : > { %889 = vst [vmem:[%s1706_s9 + $0x10] sm:$0xff] %v825_v51  ;;  %921 = vst [vmem:[%s1706_s9 + $0x110] sm:$0xff] %v857_v52  ;;  %v826_v61 = vmax.f32 %v580_v53, 0.0  ;;  %v858_v62 = vmax.f32 %v708_v54, 0.0 }
 0x14f   : > { %887 = vst [vmem:[%s1706_s9] sm:$0xff] %v823_v57  ;;  %919 = vst [vmem:[%s1706_s9 + $0x100] sm:$0xff] %v855_v58  ;;  %v824_v63 = vmax.f32 %v572_v59, 0.0  ;;  %v856_v0 = vmax.f32 %v700_v60, 0.0 }
 0x150   : > { %890 = vst [vmem:[%s1706_s9 + $0x18] sm:$0xff] %v826_v61  ;;  %922 = vst [vmem:[%s1706_s9 + $0x118] sm:$0xff] %v858_v62 }
 0x151   : > { %888 = vst [vmem:[%s1706_s9 + $0x8] sm:$0xff] %v824_v63  ;;  %920 = vst [vmem:[%s1706_s9 + $0x108] sm:$0xff] %v856_v0  ;;  %v1169_v1 = vpop.f32.mrb[4].mxu0  ;;  %v1201_v2 = vpop.f32.mrb[4].mxu1 }
 0x152   : > { %v593_v3 = vadd.f32 %v1169_v1, %v1695_v40  ;;  %v721_v4 = vadd.f32 %v1201_v2, %v1695_v40  ;;  %v584_v5 = vpop.f32.mrb[5].mxu0  ;;  %v712_v6 = vpop.f32.mrb[5].mxu1 }
 0x153   : > { %v585_v7 = vadd.f32 %v1695_v40, %v584_v5  ;;  %v713_v8 = vadd.f32 %v1695_v40, %v712_v6  ;;  %v1170_v9 = vpop.f32.mrb[6].mxu0  ;;  %v1202_v10 = vpop.f32.mrb[6].mxu1 }
 0x154   : > { %v829_v11 = vmax.f32 %v593_v3, 0.0  ;;  %v861_v12 = vmax.f32 %v721_v4, 0.0  ;;  %v596_v13 = vadd.f32 %v1170_v9, %v1695_v40  ;;  %v724_v14 = vadd.f32 %v1202_v10, %v1695_v40  ;;  %v587_v15 = vpop.f32.mrb[7].mxu0  ;;  %v715_v16 = vpop.f32.mrb[7].mxu1 }
 0x155   : > { %v827_v17 = vmax.f32 %v585_v7, 0.0  ;;  %v859_v18 = vmax.f32 %v713_v8, 0.0  ;;  %v588_v19 = vadd.f32 %v1695_v40, %v587_v15  ;;  %v716_v20 = vadd.f32 %v1695_v40, %v715_v16 }
 0x156   : > { %893 = vst [vmem:[%s1706_s9 + $0x30] sm:$0xff] %v829_v11  ;;  %925 = vst [vmem:[%s1706_s9 + $0x130] sm:$0xff] %v861_v12  ;;  %v830_v21 = vmax.f32 %v596_v13, 0.0  ;;  %v862_v22 = vmax.f32 %v724_v14, 0.0 }
 0x157   : > { %891 = vst [vmem:[%s1706_s9 + $0x20] sm:$0xff] %v827_v17  ;;  %923 = vst [vmem:[%s1706_s9 + $0x120] sm:$0xff] %v859_v18  ;;  %v828_v23 = vmax.f32 %v588_v19, 0.0  ;;  %v860_v24 = vmax.f32 %v716_v20, 0.0 }
 0x158   : > { %894 = vst [vmem:[%s1706_s9 + $0x38] sm:$0xff] %v830_v21  ;;  %926 = vst [vmem:[%s1706_s9 + $0x138] sm:$0xff] %v862_v22 }
 0x159   : > { %892 = vst [vmem:[%s1706_s9 + $0x28] sm:$0xff] %v828_v23  ;;  %924 = vst [vmem:[%s1706_s9 + $0x128] sm:$0xff] %v860_v24  ;;  %v1173_v25 = vpop.f32.mrb[8].mxu0  ;;  %v1205_v26 = vpop.f32.mrb[8].mxu1 }
 0x15a   : > { %v609_v27 = vadd.f32 %v1173_v25, %v1695_v40  ;;  %v737_v28 = vadd.f32 %v1205_v26, %v1695_v40  ;;  %v600_v29 = vpop.f32.mrb[9].mxu0  ;;  %v728_v30 = vpop.f32.mrb[9].mxu1 }
 0x15b   : > { %v601_v31 = vadd.f32 %v1695_v40, %v600_v29  ;;  %v729_v32 = vadd.f32 %v1695_v40, %v728_v30  ;;  %v1174_v33 = vpop.f32.mrb[10].mxu0  ;;  %v1206_v34 = vpop.f32.mrb[10].mxu1 }
 0x15c   : > { %v833_v35 = vmax.f32 %v609_v27, 0.0  ;;  %v865_v36 = vmax.f32 %v737_v28, 0.0  ;;  %v612_v37 = vadd.f32 %v1174_v33, %v1695_v40  ;;  %v740_v38 = vadd.f32 %v1206_v34, %v1695_v40  ;;  %v603_v39 = vpop.f32.mrb[11].mxu0  ;;  %v731_v41 = vpop.f32.mrb[11].mxu1 }
 0x15d   : > { %v831_v42 = vmax.f32 %v601_v31, 0.0  ;;  %v863_v43 = vmax.f32 %v729_v32, 0.0  ;;  %v604_v44 = vadd.f32 %v1695_v40, %v603_v39  ;;  %v732_v45 = vadd.f32 %v1695_v40, %v731_v41 }
 0x15e   : > { %897 = vst [vmem:[%s1706_s9 + $0x50] sm:$0xff] %v833_v35  ;;  %929 = vst [vmem:[%s1706_s9 + $0x150] sm:$0xff] %v865_v36  ;;  %v834_v46 = vmax.f32 %v612_v37, 0.0  ;;  %v866_v47 = vmax.f32 %v740_v38, 0.0 }
 0x15f   : > { %895 = vst [vmem:[%s1706_s9 + $0x40] sm:$0xff] %v831_v42  ;;  %927 = vst [vmem:[%s1706_s9 + $0x140] sm:$0xff] %v863_v43  ;;  %v832_v48 = vmax.f32 %v604_v44, 0.0  ;;  %v864_v49 = vmax.f32 %v732_v45, 0.0 }
 0x160   : > { %898 = vst [vmem:[%s1706_s9 + $0x58] sm:$0xff] %v834_v46  ;;  %930 = vst [vmem:[%s1706_s9 + $0x158] sm:$0xff] %v866_v47 }
 0x161   : > { %896 = vst [vmem:[%s1706_s9 + $0x48] sm:$0xff] %v832_v48  ;;  %928 = vst [vmem:[%s1706_s9 + $0x148] sm:$0xff] %v864_v49  ;;  %v1177_v50 = vpop.f32.mrb[12].mxu0  ;;  %v1209_v51 = vpop.f32.mrb[12].mxu1 }
 0x162   : > { %v625_v52 = vadd.f32 %v1177_v50, %v1695_v40  ;;  %v753_v53 = vadd.f32 %v1209_v51, %v1695_v40  ;;  %v616_v54 = vpop.f32.mrb[13].mxu0  ;;  %v744_v55 = vpop.f32.mrb[13].mxu1 }
 0x163   : > { %v617_v56 = vadd.f32 %v1695_v40, %v616_v54  ;;  %v745_v57 = vadd.f32 %v1695_v40, %v744_v55  ;;  %v1178_v58 = vpop.f32.mrb[14].mxu0  ;;  %v1210_v59 = vpop.f32.mrb[14].mxu1 }
 0x164   : > { %v837_v60 = vmax.f32 %v625_v52, 0.0  ;;  %v869_v61 = vmax.f32 %v753_v53, 0.0  ;;  %v628_v62 = vadd.f32 %v1178_v58, %v1695_v40  ;;  %v756_v63 = vadd.f32 %v1210_v59, %v1695_v40  ;;  %v619_v0 = vpop.f32.mrb[15].mxu0  ;;  %v747_v1 = vpop.f32.mrb[15].mxu1 }
 0x165   : > { %v835_v2 = vmax.f32 %v617_v56, 0.0  ;;  %v867_v3 = vmax.f32 %v745_v57, 0.0  ;;  %v620_v4 = vadd.f32 %v1695_v40, %v619_v0  ;;  %v748_v5 = vadd.f32 %v1695_v40, %v747_v1 }
 0x166   : > { %901 = vst [vmem:[%s1706_s9 + $0x70] sm:$0xff] %v837_v60  ;;  %933 = vst [vmem:[%s1706_s9 + $0x170] sm:$0xff] %v869_v61  ;;  %v838_v6 = vmax.f32 %v628_v62, 0.0  ;;  %v870_v7 = vmax.f32 %v756_v63, 0.0 }
 0x167   : > { %899 = vst [vmem:[%s1706_s9 + $0x60] sm:$0xff] %v835_v2  ;;  %931 = vst [vmem:[%s1706_s9 + $0x160] sm:$0xff] %v867_v3  ;;  %v836_v8 = vmax.f32 %v620_v4, 0.0  ;;  %v868_v9 = vmax.f32 %v748_v5, 0.0 }
 0x168   : > { %902 = vst [vmem:[%s1706_s9 + $0x78] sm:$0xff] %v838_v6  ;;  %934 = vst [vmem:[%s1706_s9 + $0x178] sm:$0xff] %v870_v7 }
 0x169   : > { %900 = vst [vmem:[%s1706_s9 + $0x68] sm:$0xff] %v836_v8  ;;  %932 = vst [vmem:[%s1706_s9 + $0x168] sm:$0xff] %v868_v9  ;;  %v1181_v10 = vpop.f32.mrb[16].mxu0  ;;  %v1213_v11 = vpop.f32.mrb[16].mxu1 }
 0x16a   : > { %v641_v12 = vadd.f32 %v1181_v10, %v1695_v40  ;;  %v769_v13 = vadd.f32 %v1213_v11, %v1695_v40  ;;  %v632_v14 = vpop.f32.mrb[17].mxu0  ;;  %v760_v15 = vpop.f32.mrb[17].mxu1 }
 0x16b   : > { %v633_v16 = vadd.f32 %v1695_v40, %v632_v14  ;;  %v761_v17 = vadd.f32 %v1695_v40, %v760_v15  ;;  %v1182_v18 = vpop.f32.mrb[18].mxu0  ;;  %v1214_v19 = vpop.f32.mrb[18].mxu1 }
 0x16c   : > { %v841_v20 = vmax.f32 %v641_v12, 0.0  ;;  %v873_v21 = vmax.f32 %v769_v13, 0.0  ;;  %v644_v22 = vadd.f32 %v1182_v18, %v1695_v40  ;;  %v772_v23 = vadd.f32 %v1214_v19, %v1695_v40  ;;  %v635_v24 = vpop.f32.mrb[19].mxu0  ;;  %v763_v25 = vpop.f32.mrb[19].mxu1 }
 0x16d   : > { %v839_v26 = vmax.f32 %v633_v16, 0.0  ;;  %v871_v27 = vmax.f32 %v761_v17, 0.0  ;;  %v636_v28 = vadd.f32 %v1695_v40, %v635_v24  ;;  %v764_v29 = vadd.f32 %v1695_v40, %v763_v25 }
 0x16e   : > { %905 = vst [vmem:[%s1706_s9 + $0x90] sm:$0xff] %v841_v20  ;;  %937 = vst [vmem:[%s1706_s9 + $0x190] sm:$0xff] %v873_v21  ;;  %v842_v30 = vmax.f32 %v644_v22, 0.0  ;;  %v874_v31 = vmax.f32 %v772_v23, 0.0 }
 0x16f   : > { %903 = vst [vmem:[%s1706_s9 + $0x80] sm:$0xff] %v839_v26  ;;  %935 = vst [vmem:[%s1706_s9 + $0x180] sm:$0xff] %v871_v27  ;;  %v840_v32 = vmax.f32 %v636_v28, 0.0  ;;  %v872_v33 = vmax.f32 %v764_v29, 0.0 }
 0x170   : > { %906 = vst [vmem:[%s1706_s9 + $0x98] sm:$0xff] %v842_v30  ;;  %938 = vst [vmem:[%s1706_s9 + $0x198] sm:$0xff] %v874_v31 }
 0x171   : > { %904 = vst [vmem:[%s1706_s9 + $0x88] sm:$0xff] %v840_v32  ;;  %936 = vst [vmem:[%s1706_s9 + $0x188] sm:$0xff] %v872_v33  ;;  %v1185_v34 = vpop.f32.mrb[20].mxu0  ;;  %v1217_v35 = vpop.f32.mrb[20].mxu1 }
 0x172   : > { %v657_v36 = vadd.f32 %v1185_v34, %v1695_v40  ;;  %v785_v37 = vadd.f32 %v1217_v35, %v1695_v40  ;;  %v648_v38 = vpop.f32.mrb[21].mxu0  ;;  %v776_v39 = vpop.f32.mrb[21].mxu1 }
 0x173   : > { %v649_v41 = vadd.f32 %v1695_v40, %v648_v38  ;;  %v777_v42 = vadd.f32 %v1695_v40, %v776_v39  ;;  %v1186_v43 = vpop.f32.mrb[22].mxu0  ;;  %v1218_v44 = vpop.f32.mrb[22].mxu1 }
 0x174   : > { %v845_v45 = vmax.f32 %v657_v36, 0.0  ;;  %v877_v46 = vmax.f32 %v785_v37, 0.0  ;;  %v660_v47 = vadd.f32 %v1186_v43, %v1695_v40  ;;  %v788_v48 = vadd.f32 %v1218_v44, %v1695_v40  ;;  %v651_v49 = vpop.f32.mrb[23].mxu0  ;;  %v779_v50 = vpop.f32.mrb[23].mxu1 }
 0x175   : > { %v843_v51 = vmax.f32 %v649_v41, 0.0  ;;  %v875_v52 = vmax.f32 %v777_v42, 0.0  ;;  %v652_v53 = vadd.f32 %v1695_v40, %v651_v49  ;;  %v780_v54 = vadd.f32 %v1695_v40, %v779_v50 }
 0x176   : > { %909 = vst [vmem:[%s1706_s9 + $0xb0] sm:$0xff] %v845_v45  ;;  %941 = vst [vmem:[%s1706_s9 + $0x1b0] sm:$0xff] %v877_v46  ;;  %v846_v55 = vmax.f32 %v660_v47, 0.0  ;;  %v878_v56 = vmax.f32 %v788_v48, 0.0 }
 0x177   : > { %907 = vst [vmem:[%s1706_s9 + $0xa0] sm:$0xff] %v843_v51  ;;  %939 = vst [vmem:[%s1706_s9 + $0x1a0] sm:$0xff] %v875_v52  ;;  %v844_v57 = vmax.f32 %v652_v53, 0.0  ;;  %v876_v58 = vmax.f32 %v780_v54, 0.0 }
 0x178   : > { %910 = vst [vmem:[%s1706_s9 + $0xb8] sm:$0xff] %v846_v55  ;;  %942 = vst [vmem:[%s1706_s9 + $0x1b8] sm:$0xff] %v878_v56 }
 0x179   : > { %908 = vst [vmem:[%s1706_s9 + $0xa8] sm:$0xff] %v844_v57  ;;  %940 = vst [vmem:[%s1706_s9 + $0x1a8] sm:$0xff] %v876_v58  ;;  %v1189_v59 = vpop.f32.mrb[24].mxu0  ;;  %v1221_v60 = vpop.f32.mrb[24].mxu1 }
 0x17a   : > { %v673_v61 = vadd.f32 %v1189_v59, %v1695_v40  ;;  %v801_v62 = vadd.f32 %v1221_v60, %v1695_v40  ;;  %v664_v63 = vpop.f32.mrb[25].mxu0  ;;  %v792_v0 = vpop.f32.mrb[25].mxu1 }
 0x17b   : > { %v665_v1 = vadd.f32 %v1695_v40, %v664_v63  ;;  %v793_v2 = vadd.f32 %v1695_v40, %v792_v0  ;;  %v1190_v3 = vpop.f32.mrb[26].mxu0  ;;  %v1222_v4 = vpop.f32.mrb[26].mxu1 }
 0x17c   : > { %v849_v5 = vmax.f32 %v673_v61, 0.0  ;;  %v881_v6 = vmax.f32 %v801_v62, 0.0  ;;  %v676_v7 = vadd.f32 %v1190_v3, %v1695_v40  ;;  %v804_v8 = vadd.f32 %v1222_v4, %v1695_v40  ;;  %v667_v9 = vpop.f32.mrb[27].mxu0  ;;  %v795_v10 = vpop.f32.mrb[27].mxu1 }
 0x17d   : > { %v847_v11 = vmax.f32 %v665_v1, 0.0  ;;  %v879_v12 = vmax.f32 %v793_v2, 0.0  ;;  %v668_v13 = vadd.f32 %v1695_v40, %v667_v9  ;;  %v796_v14 = vadd.f32 %v1695_v40, %v795_v10 }
 0x17e   : > { %913 = vst [vmem:[%s1706_s9 + $0xd0] sm:$0xff] %v849_v5  ;;  %945 = vst [vmem:[%s1706_s9 + $0x1d0] sm:$0xff] %v881_v6  ;;  %v850_v15 = vmax.f32 %v676_v7, 0.0  ;;  %v882_v16 = vmax.f32 %v804_v8, 0.0 }
 0x17f   : > { %911 = vst [vmem:[%s1706_s9 + $0xc0] sm:$0xff] %v847_v11  ;;  %943 = vst [vmem:[%s1706_s9 + $0x1c0] sm:$0xff] %v879_v12  ;;  %v848_v17 = vmax.f32 %v668_v13, 0.0  ;;  %v880_v18 = vmax.f32 %v796_v14, 0.0 }
 0x180   : > { %914 = vst [vmem:[%s1706_s9 + $0xd8] sm:$0xff] %v850_v15  ;;  %946 = vst [vmem:[%s1706_s9 + $0x1d8] sm:$0xff] %v882_v16 }
 0x181   : > { %912 = vst [vmem:[%s1706_s9 + $0xc8] sm:$0xff] %v848_v17  ;;  %944 = vst [vmem:[%s1706_s9 + $0x1c8] sm:$0xff] %v880_v18  ;;  %v1193_v19 = vpop.f32.mrb[28].mxu0  ;;  %v1225_v20 = vpop.f32.mrb[28].mxu1 }
 0x182   : > { %v689_v21 = vadd.f32 %v1193_v19, %v1695_v40  ;;  %v817_v22 = vadd.f32 %v1225_v20, %v1695_v40  ;;  %v680_v23 = vpop.f32.mrb[29].mxu0  ;;  %v808_v24 = vpop.f32.mrb[29].mxu1 }
 0x183   : > { %v681_v25 = vadd.f32 %v1695_v40, %v680_v23  ;;  %v809_v26 = vadd.f32 %v1695_v40, %v808_v24  ;;  %v1194_v27 = vpop.f32.mrb[30].mxu0  ;;  %v1226_v28 = vpop.f32.mrb[30].mxu1 }
 0x184   : > { %v853_v29 = vmax.f32 %v689_v21, 0.0  ;;  %v885_v30 = vmax.f32 %v817_v22, 0.0  ;;  %v692_v31 = vadd.f32 %v1194_v27, %v1695_v40  ;;  %v820_v32 = vadd.f32 %v1226_v28, %v1695_v40  ;;  %v683_v33 = vpop.f32.mrb[31].mxu0  ;;  %v811_v34 = vpop.f32.mrb[31].mxu1 }
 0x185   : > { %v851_v35 = vmax.f32 %v681_v25, 0.0  ;;  %v883_v36 = vmax.f32 %v809_v26, 0.0  ;;  %v684_v37 = vadd.f32 %v1695_v40, %v683_v33  ;;  %v812_v38 = vadd.f32 %v1695_v40, %v811_v34 }
 0x186   : > { %917 = vst [vmem:[%s1706_s9 + $0xf0] sm:$0xff] %v853_v29  ;;  %949 = vst [vmem:[%s1706_s9 + $0x1f0] sm:$0xff] %v885_v30  ;;  %v854_v39 = vmax.f32 %v692_v31, 0.0  ;;  %v886_v41 = vmax.f32 %v820_v32, 0.0 }
 0x187   : > { %915 = vst [vmem:[%s1706_s9 + $0xe0] sm:$0xff] %v851_v35  ;;  %947 = vst [vmem:[%s1706_s9 + $0x1e0] sm:$0xff] %v883_v36  ;;  %v852_v42 = vmax.f32 %v684_v37, 0.0  ;;  %v884_v43 = vmax.f32 %v812_v38, 0.0 }
 0x188   : > { %918 = vst [vmem:[%s1706_s9 + $0xf8] sm:$0xff] %v854_v39  ;;  %950 = vst [vmem:[%s1706_s9 + $0x1f8] sm:$0xff] %v886_v41 }
 0x189   : > { %916 = vst [vmem:[%s1706_s9 + $0xe8] sm:$0xff] %v852_v42  ;;  %948 = vst [vmem:[%s1706_s9 + $0x1e8] sm:$0xff] %v884_v43 }
 0x18a   : > { %1415 = shalt.err (!%p1412_p7)
}
 0x18b   : > { %s1416_s22 = scalar_lea.hbm %s1827_s5, 8192  ;;  %s1420_s11 = scalar_lea.hbm %s1882_s3, 16384 }
 0x18c   : > { %p1417_p9 = scmp.ne.s32.totalorder %s1827_s5, %s1416_s22  ;;  %p1421_p5 = scmp.lt.u32.totalorder %s1827_s5, %s1882_s3 }
 0x18d   : > { %p1422_p11 = scmp.lt.u32.totalorder %s1420_s11, %s1416_s22  ;;  %p1424_p4 = scmp.lt.u32.totalorder %s1416_s22, %s1827_s5 }
 0x18e   : > { %p1418_p1 = pnand %p1417_p9, %p1595_p12 }
 0x18f   : > { %p1423_p2 = por %p1422_p11, %p1421_p5 }
 0x190   : > { %p1419_p0 = pneg %p1418_p1 }
 0x191   : > { %p1425_p6 = por %p1424_p4, %p1423_p2 }
 0x193   : > { %p1426_p8 = pnand %p1425_p6, %p1419_p0 }
 0x195   : > { %1429 = shalt.err (!%p1426_p8)
}
 0x196   : > { %s1479_s8 = smov 128   ;;  %s1480_s9 = smov 8  }
 0x197   : > { %1249 = dma.vmem_to_hbm [thread:$0]  (%p1595_p12), %s1829_s25, 8192, %s1827_s5, %s952_s27, %s1479_s8, %s1479_s8, %s1480_s9  }
 0x198 PF: > { %s980_s4 = sand.u32 1, %s1460_s12   ;;  %p1897_p10 = scmp.ne.s32.totalorder %s1887_s19, 0 }
 0x199   : > { %p1898_p13 = scmp.ge.s32.totalorder %s1472_s15, 2  ;;  %s981_s16 = scalar_lea.sflag [#allocation4], %s980_s4 }
 0x19b   : > { %p1260_p3 = pnand %p1898_p13, %p1897_p10 }
 0x19d   : > { %1455 = dma.done.wait (!%p1260_p3), %s981_s16, 8192  }
 0x19e   : > { %1457 = vsyncadd (!%p1260_p3), %s981_s16, 4294959104  ;;  %p17_p7 = scmp.ge.s32.totalorder %s1557_s24, 4   ;;  %s1899_s12 = smov %s1464_s13 }
 0x19f   : > { %s1900_s13 = smov %s1468_s14  ;;  %s1901_s14 = smov %s1591_s17 }
 0x1a0   : > { %s1902_s15 = smov %s1557_s24  ;;  %19 = sbr.rel (!%p17_p7) target bundleno = 6 (0x6), region = 81 }
 0x1a7   :  { %986 = vsyncpa [#allocation3], 1 }
 0x1a8   :  { %988 = vsyncpa [#allocation3 + $0x1], 1 }
 0x1a9   :  { %989 = vsyncpa [#allocation6], 1 }
 0x1aa   :  { %990 = vsyncpa [#allocation4], 1 }
 0x1ab   :  { %992 = vsyncpa [#allocation4 + $0x1], 1 }

</bundles_post_ra>
